<compile_context>
chip_gen: v7x
topology: tpu7x:2x2x1
jax: 0.10.0
libtpu: 0.0.40
codegen_flags: <defaults>
</compile_context>

<pallas_src>
import jax
import jax.numpy as jnp
from jax.experimental import pallas as pl
from jax.experimental.pallas import tpu as pltpu


def _mlp_kernel(x_ref, w1_ref, b1_ref, w2_ref, b2_ref, w3t_ref, b3_ref, o_ref):
    """One batch tile per grid step; all three GEMMs + ReLUs fused."""
    x = x_ref[...]                                                     # (TB, N)
    h1 = jnp.dot(x, w1_ref[...], preferred_element_type=jnp.float32)
    h1 = jnp.maximum(h1 + b1_ref[...], 0.0)                            # (TB, 32) f32
    h2 = jnp.dot(h1, w2_ref[...], preferred_element_type=jnp.float32)
    h2 = jnp.maximum(h2 + b2_ref[...], 0.0)                            # (TB, 16) f32
    # Final layer computed transposed (w3t @ h2.T) so the logits come out as a
    # lane-dense (1, TB) row: 4 output bytes per batch row, unmasked stores.
    out_t = jax.lax.dot_general(
        w3t_ref[...], h2, (((1,), (1,)), ((), ())),
        preferred_element_type=jnp.float32)                            # (1, TB)
    out_t = out_t + b3_ref[...]
    o_ref[...] = out_t[None].astype(o_ref.dtype)                       # (1, 1, TB)


def _vmem_capacity_bytes():
    """Physical VMEM per core (generation-aware), conservative fallback."""
    try:
        cap = int(getattr(pltpu.get_tpu_info(), "vmem_capacity_bytes", 0))
        if cap > 0:
            return cap
    except Exception:
        pass
    return 64 << 20  # v7x-sized fallback: safe on every generation


def _choose_tb(batch, n_features, itemsize, x_tile_budget):
    """Batch-tile rows: as large as the per-buffer x budget allows, rounded to the
    sublane multiple, capped at the (rounded) batch, and capped at half the batch
    so the grid has >=2 steps (v7x: both TensorCores get work)."""
    sub = {4: 8, 2: 16, 1: 32}.get(itemsize, 8)
    b_round = ((batch + sub - 1) // sub) * sub
    rows = x_tile_budget // max(1, n_features * itemsize)
    rows = max(sub, (rows // sub) * sub)
    tb = min(rows, b_round)
    if b_round >= 2 * sub:  # keep >=2 grid steps when the batch allows it
        half = ((b_round // 2 + sub - 1) // sub) * sub
        tb = min(tb, half)
    return max(sub, tb)


def neural_network2_forward(x, params):
    """x: any shape (B, ...). Returns logits of shape (B, 1), float32."""
    b = x.shape[0]
    x2d = x.reshape(b, -1)                       # nn.Flatten(), native dtype
    n_features = x2d.shape[1]
    w1, b1, w2, b2, w3, b3 = params

    # Param dtype normalization: layer-1 weights follow x's dtype (native bf16 MXU
    # path when x is bf16); downstream params stay f32 (activations are f32).
    w1c = w1.astype(x2d.dtype) if x2d.dtype == jnp.bfloat16 else w1.astype(jnp.float32)
    b1f, w2f, b2f, b3f = (p.astype(jnp.float32) for p in (b1, w2, b2, b3))
    w3t = w3.astype(jnp.float32).reshape(1, -1)  # (1, 16); tiny, constant-folds under jit

    itemsize = jnp.dtype(x2d.dtype).itemsize
    vmem_cap = _vmem_capacity_bytes()
    vmem_budget = (vmem_cap * 3) // 4            # leave 25% headroom for the compiler
    x_tile_budget = min(16 << 20, max(1 << 20, (vmem_budget - (8 << 20)) // 2))
    tb = _choose_tb(b, n_features, itemsize, x_tile_budget)
    grid = pl.cdiv(b, tb)                        # partial last block handled by Pallas

    param_bytes = sum(int(p.size) * jnp.dtype(p.dtype).itemsize
                      for p in (w1c, b1f, w2f, b2f, w3t, b3f))
    vmem_limit = (2 * tb * n_features * itemsize   # double-buffered x tiles
                  + 2 * tb * 4                     # double-buffered logits tiles
                  + 2 * param_bytes                # resident weights/biases
                  + (4 << 20))                     # compiler scratch headroom
    vmem_limit = int(min(max(vmem_limit, 16 << 20), vmem_budget))
    # TODO(synk): for extremely wide flatten widths (~1M f32 features) even the
    # minimum 8-row tile overflows VMEM when double-buffered; add a K-axis
    # ("arbitrary") grid with an f32 accumulator for layer 1 in that regime.

    cost = pl.CostEstimate(
        flops=2 * b * (n_features * 32 + 32 * 16 + 16),
        transcendentals=0,
        bytes_accessed=int(b * n_features * itemsize + b * 4 + param_bytes),
    )

    const = lambda shape: pl.BlockSpec(shape, lambda i: (0,) * len(shape))

    out = pl.pallas_call(
        _mlp_kernel,
        out_shape=jax.ShapeDtypeStruct((grid, 1, tb), jnp.float32),
        grid=(grid,),
        in_specs=[
            pl.BlockSpec((tb, n_features), lambda i: (i, 0)),   # x: streamed
            const(w1c.shape), const(b1f.shape),                 # params: VMEM-resident
            const(w2f.shape), const(b2f.shape),
            const(w3t.shape), const(b3f.shape),
        ],
        out_specs=pl.BlockSpec((1, 1, tb), lambda i: (i, 0, 0)),
        compiler_params=pltpu.CompilerParams(
            dimension_semantics=("parallel",),
            vmem_limit_bytes=vmem_limit,
        ),
        cost_estimate=cost,
    )(x2d, w1c, b1f, w2f, b2f, w3t, b3f)

    # Flat position j in the (grid, 1, tb) slab corresponds to batch row j.
    return out.reshape(-1)[:b].reshape(b, 1)


def init_params(n_features, key, dtype=jnp.float32):
    """Deterministic init mimicking torch.nn.Linear (uniform +-1/sqrt(fan_in)).
    Weights stored as (in, out); biases as (1, out)."""
    def linear(key, fan_in, fan_out):
        kw, kb = jax.random.split(key)
        bound = 1.0 / jnp.sqrt(jnp.float32(fan_in))
        w = jax.random.uniform(kw, (fan_in, fan_out), jnp.float32, -bound, bound)
        b = jax.random.uniform(kb, (1, fan_out), jnp.float32, -bound, bound)
        return w.astype(dtype), b.astype(dtype)

    k1, k2, k3 = jax.random.split(key, 3)
    w1, b1 = linear(k1, n_features, 32)
    w2, b2 = linear(k2, 32, 16)
    w3, b3 = linear(k3, 16, 1)
    return (w1, b1, w2, b2, w3, b3)


def _reference_forward(x, params):
    w1, b1, w2, b2, w3, b3 = params
    x2d = x.reshape(x.shape[0], -1).astype(jnp.float32)
    h1 = jnp.maximum(x2d @ w1.astype(jnp.float32) + b1.astype(jnp.float32), 0.0)
    h2 = jnp.maximum(h1 @ w2.astype(jnp.float32) + b2.astype(jnp.float32), 0.0)
    return h2 @ w3.astype(jnp.float32) + b3.astype(jnp.float32)


if __name__ == "__main__":
    key = jax.random.PRNGKey(0)
    k_x, k_p = jax.random.split(key)

    # N_features = 16, presented as (batch=8, 4, 4) so nn.Flatten() is exercised.
    batch, n_features = 8, 16
    x = jax.random.normal(k_x, (batch, 4, 4), dtype=jnp.float32)
    params = init_params(n_features, k_p)

    logits = neural_network2_forward(x, params)
    jax.block_until_ready(logits)

    ref = _reference_forward(x, params)
    assert logits.shape == (batch, 1)
    assert jnp.allclose(logits, ref, atol=1e-4, rtol=1e-4)

    # Non-multiple-of-tile batch -> exercises the partial-last-block path (no pad copy)
    # and a multi-step grid.
    x2 = jax.random.normal(k_x, (13, 4, 4), dtype=jnp.float32)
    logits2 = neural_network2_forward(x2, params)
    jax.block_until_ready(logits2)
    assert logits2.shape == (13, 1)
    assert jnp.allclose(logits2, _reference_forward(x2, params), atol=1e-4, rtol=1e-4)

    print("KERNEL_OK")
</pallas_src>

<mosaic_0001>
module attributes {stable_mosaic.version = 11 : i64} {
  func.func @_mlp_kernel(%arg0: i32, %arg1: memref<8x16xf32, #tpu.memory_space<vmem>>, %arg2: memref<16x32xf32, #tpu.memory_space<vmem>>, %arg3: memref<1x32xf32, #tpu.memory_space<vmem>>, %arg4: memref<32x16xf32, #tpu.memory_space<vmem>>, %arg5: memref<1x16xf32, #tpu.memory_space<vmem>>, %arg6: memref<1x16xf32, #tpu.memory_space<vmem>>, %arg7: memref<1x1xf32, #tpu.memory_space<vmem>>, %arg8: memref<1x1x8xf32, #tpu.memory_space<vmem>>) attributes {dimension_semantics = [#tpu.dimension_semantics<parallel>], iteration_bounds = array<i64: 1>, scalar_prefetch = 0 : i64, scratch_operands = 0 : i64, tpu.core_type = #tpu.core_type<tc>, window_params = [{transform_indices = @transform_0, window_bounds = array<i64: 8, 16>}, {pipeline_mode = #tpu.pipeline_mode<synchronous>, transform_indices = @transform_1, window_bounds = array<i64: 16, 32>}, {pipeline_mode = #tpu.pipeline_mode<synchronous>, transform_indices = @transform_2, window_bounds = array<i64: 1, 32>}, {pipeline_mode = #tpu.pipeline_mode<synchronous>, transform_indices = @transform_3, window_bounds = array<i64: 32, 16>}, {pipeline_mode = #tpu.pipeline_mode<synchronous>, transform_indices = @transform_4, window_bounds = array<i64: 1, 16>}, {pipeline_mode = #tpu.pipeline_mode<synchronous>, transform_indices = @transform_5, window_bounds = array<i64: 1, 16>}, {pipeline_mode = #tpu.pipeline_mode<synchronous>, transform_indices = @transform_6, window_bounds = array<i64: 1, 1>}, {transform_indices = @transform_7, window_bounds = array<i64: 1, 1, 8>}]} {
    %c0 = arith.constant 0 : index
    %c0_0 = arith.constant 0 : index
    %0 = vector.load %arg1[%c0, %c0_0] : memref<8x16xf32, #tpu.memory_space<vmem>>, vector<8x16xf32>
    %c0_1 = arith.constant 0 : index
    %c0_2 = arith.constant 0 : index
    %1 = vector.load %arg2[%c0_1, %c0_2] : memref<16x32xf32, #tpu.memory_space<vmem>>, vector<16x32xf32>
    %cst = arith.constant dense<0.000000e+00> : vector<8x32xf32>
    %2 = tpu.matmul %0, %1, %cst {dimension_numbers = #tpu.dot_dimension_numbers<[1], [0], [0], [1], [0, 0, 1, 1], [], []>} : vector<8x16xf32>, vector<16x32xf32>, vector<8x32xf32> -> vector<8x32xf32>
    %c0_3 = arith.constant 0 : index
    %c0_4 = arith.constant 0 : index
    %3 = vector.load %arg3[%c0_3, %c0_4] : memref<1x32xf32, #tpu.memory_space<vmem>>, vector<1x32xf32>
    %4 = vector.broadcast %3 : vector<1x32xf32> to vector<8x32xf32>
    %5 = arith.addf %2, %4 : vector<8x32xf32>
    %cst_5 = arith.constant 0.000000e+00 : f32
    %6 = vector.broadcast %cst_5 : f32 to vector<8x32xf32>
    %7 = arith.maximumf %5, %6 : vector<8x32xf32>
    %c0_6 = arith.constant 0 : index
    %c0_7 = arith.constant 0 : index
    %8 = vector.load %arg4[%c0_6, %c0_7] : memref<32x16xf32, #tpu.memory_space<vmem>>, vector<32x16xf32>
    %cst_8 = arith.constant dense<0.000000e+00> : vector<8x16xf32>
    %9 = tpu.matmul %7, %8, %cst_8 {dimension_numbers = #tpu.dot_dimension_numbers<[1], [0], [0], [1], [0, 0, 1, 1], [], []>} : vector<8x32xf32>, vector<32x16xf32>, vector<8x16xf32> -> vector<8x16xf32>
    %c0_9 = arith.constant 0 : index
    %c0_10 = arith.constant 0 : index
    %10 = vector.load %arg5[%c0_9, %c0_10] : memref<1x16xf32, #tpu.memory_space<vmem>>, vector<1x16xf32>
    %11 = vector.broadcast %10 : vector<1x16xf32> to vector<8x16xf32>
    %12 = arith.addf %9, %11 : vector<8x16xf32>
    %cst_11 = arith.constant 0.000000e+00 : f32
    %13 = vector.broadcast %cst_11 : f32 to vector<8x16xf32>
    %14 = arith.maximumf %12, %13 : vector<8x16xf32>
    %c0_12 = arith.constant 0 : index
    %c0_13 = arith.constant 0 : index
    %15 = vector.load %arg6[%c0_12, %c0_13] : memref<1x16xf32, #tpu.memory_space<vmem>>, vector<1x16xf32>
    %cst_14 = arith.constant dense<0.000000e+00> : vector<1x8xf32>
    %16 = tpu.matmul %15, %14, %cst_14 {dimension_numbers = #tpu.dot_dimension_numbers<[1], [1], [0], [0], [0, 0, 1, 0], [], []>} : vector<1x16xf32>, vector<8x16xf32>, vector<1x8xf32> -> vector<1x8xf32>
    %c0_15 = arith.constant 0 : index
    %c0_16 = arith.constant 0 : index
    %17 = vector.load %arg7[%c0_15, %c0_16] : memref<1x1xf32, #tpu.memory_space<vmem>>, vector<1x1xf32>
    %18 = vector.broadcast %17 : vector<1x1xf32> to vector<1x8xf32>
    %19 = arith.addf %16, %18 : vector<1x8xf32>
    %20 = vector.shape_cast %19 : vector<1x8xf32> to vector<1x1x8xf32>
    %c0_17 = arith.constant 0 : index
    %c0_18 = arith.constant 0 : index
    %c0_19 = arith.constant 0 : index
    %21 = vector.load %arg8[%c0_17, %c0_18, %c0_19] : memref<1x1x8xf32, #tpu.memory_space<vmem>>, vector<1x1x8xf32>
    tpu.vector_store %arg8[%c0_17, %c0_18, %c0_19], %20 {strides = array<i32>} : memref<1x1x8xf32, #tpu.memory_space<vmem>>, vector<1x1x8xf32>,
    return
  }
  func.func @transform_0(%arg0: i32) -> (i32, i32) {
    %c0_i32 = arith.constant 0 : i32
    %c0_i32_0 = arith.constant 0 : i32
    return %arg0, %c0_i32 : i32, i32
  }
  func.func @transform_1(%arg0: i32) -> (i32, i32) {
    %c0_i32 = arith.constant 0 : i32
    %c0_i32_0 = arith.constant 0 : i32
    %c0_i32_1 = arith.constant 0 : i32
    return %c0_i32, %c0_i32_0 : i32, i32
  }
  func.func @transform_2(%arg0: i32) -> (i32, i32) {
    %c0_i32 = arith.constant 0 : i32
    %c0_i32_0 = arith.constant 0 : i32
    %c0_i32_1 = arith.constant 0 : i32
    return %c0_i32, %c0_i32_0 : i32, i32
  }
  func.func @transform_3(%arg0: i32) -> (i32, i32) {
    %c0_i32 = arith.constant 0 : i32
    %c0_i32_0 = arith.constant 0 : i32
    %c0_i32_1 = arith.constant 0 : i32
    return %c0_i32, %c0_i32_0 : i32, i32
  }
  func.func @transform_4(%arg0: i32) -> (i32, i32) {
    %c0_i32 = arith.constant 0 : i32
    %c0_i32_0 = arith.constant 0 : i32
    %c0_i32_1 = arith.constant 0 : i32
    return %c0_i32, %c0_i32_0 : i32, i32
  }
  func.func @transform_5(%arg0: i32) -> (i32, i32) {
    %c0_i32 = arith.constant 0 : i32
    %c0_i32_0 = arith.constant 0 : i32
    %c0_i32_1 = arith.constant 0 : i32
    return %c0_i32, %c0_i32_0 : i32, i32
  }
  func.func @transform_6(%arg0: i32) -> (i32, i32) {
    %c0_i32 = arith.constant 0 : i32
    %c0_i32_0 = arith.constant 0 : i32
    %c0_i32_1 = arith.constant 0 : i32
    return %c0_i32, %c0_i32_0 : i32, i32
  }
  func.func @transform_7(%arg0: i32) -> (i32, i32, i32) {
    %c0_i32 = arith.constant 0 : i32
    %c0_i32_0 = arith.constant 0 : i32
    %c0_i32_1 = arith.constant 0 : i32
    return %arg0, %c0_i32, %c0_i32_0 : i32, i32, i32
  }
}

</mosaic_0001>

<bundles_post_ra>
// kernel: tpu_custom_call.1
= control target key start
LH: loop header
LB: loop body
LE: loop exit
PB: predicated region body
PF: predicated region fallthrough
CT: control target
= control target key end

     0   :  { %s477_s0 = inlined_call_operand.vmem [shape: f32[8,16], index: 0, kind: input, shape index: {}]   ;;  %s478_s1 = inlined_call_operand.vmem [shape: f32[16,32], index: 1, kind: input, shape index: {}]   ;;  %s479_s2 = inlined_call_operand.vmem [shape: f32[1,32], index: 2, kind: input, shape index: {}]   ;;  %s480_s3 = inlined_call_operand.vmem [shape: f32[32,16], index: 3, kind: input, shape index: {}]   ;;  %s481_s4 = inlined_call_operand.vmem [shape: f32[1,16], index: 4, kind: input, shape index: {}]   ;;  %s482_s5 = inlined_call_operand.vmem [shape: f32[1,16], index: 5, kind: input, shape index: {}]   ;;  %s483_s6 = inlined_call_operand.<no memory space> [shape: f32[1,1], index: 6, kind: input, shape index: {}]   ;;  %s484_s7 = inlined_call_operand.hbm [shape: f32[1,1,8], index: 7, kind: output, shape index: {}]  }
   0x1   :  { %v12_v0 = vstv %s483_s6 }
   0x2   :  { %13 = vst [vmem:[#allocation2] sm:$0x1] %v12_v0 }
   0x3   :  { %v30_v1 = vld [vmem:[%s478_s1] sm:$0xff]  ;;  %v31_v2 = vld [vmem:[%s478_s1 + $0x8] sm:$0xff]  ;;  %v381_v3 = vmov 0.0|0.0   ;;  %vm382_vm0 = vmmov 0   ;;  %v383_v5 = vmov 0.0  }
   0x4   :  { %342 = vmatprep.subr.bf16.mxu0 %v381_v3  ;;  %v343_v4 = vpack.c.bf16 %v31_v2, %v30_v1  ;;  %323 = vmatprep.mubr.msk.f32.mxu0 %vm382_vm0, %v383_v5  ;;  %v114_v6 = vld [vmem:[%s480_s3] sm:$0xff]  ;;  %v115_v7 = vld [vmem:[%s480_s3 + $0x8] sm:$0xff] }
   0x5   :  { %345 = vmatprep.subr.bf16.mxu1 %v381_v3  ;;  %v346_v8 = vpack.c.bf16 %v115_v7, %v114_v6  ;;  %334 = vmatprep.mubr.msk.f32.mxu1 %vm382_vm0, %v383_v5 }
   0x6   :  { %14 = vsyncpa [#allocation4], 0  ;;  %344 = vmatpush3.bf16.msra.mxu0 %v343_v4  ;;  %v29_v9 = vld [vmem:[%s477_s0] sm:$0xff]  ;;  %vm39_vm1 = vcmask 130048   ;;  %v116_v10 = vld [vmem:[%s480_s3 + $0x10] sm:$0xff]  ;;  %vm125_vm2 = vcmask 261120   ;;  %v207_v26 = vlaneseq }
   0x7   :  { %347 = vmatpush3.bf16.msra.mxu1 %v346_v8  ;;  %337 = vmatprep.subr.mxu0 %v383_v5  ;;  %v117_v11 = vld [vmem:[%s480_s3 + $0x18] sm:$0xff]  ;;  %v303_v13 = vld [vmem:[%s479_s2] ss:$0 sm:$0xff]  ;;  %v384_v19 = vmov 0   ;;  %s385_s18 = smov [#allocation3]   ;;  %vm287_vm3 = vcmask 57344  }
   0x8   :  { %348 = vmatprep.subr.bf16.mxu1 %v381_v3  ;;  %v349_v12 = vpack.c.bf16 %v117_v11, %v116_v10  ;;  %356 = vset.pattern.permute.xlu0 %v384_v19  ;;  %v305_v20 = vld [vmem:[%s481_s4] ss:$0 sm:$0xff]  ;;  %v208_v27 = vshrl.u32 %v207_v26, 7  ;;  %s295_s19 = sshll.u32 %s385_s18, 4  ;;  %s296_s19 = int_to_ptr.vmem [resolvable:$true] %s295_s19 }
   0x9   :  { %324 = vmatmul.mubr.msk.f32.vlgmr.msra.gmra.mrb[0].mxu0 %vm39_vm1, %v29_v9  ;;  %v201_v18 = vld [vmem:[#allocation2] sm:$0x1]  ;;  %s357_s4 = scalar_lea.vmem %s296_s19, 16  ;;  %s361_s20 = scalar_lea.vmem %s296_s19, 32 }
   0xa   :  { %339 = vmatprep.mubr.msk.f32.mxu0 %vm382_vm0, %v383_v5  ;;  %204 = vperm.xlu0 %356, %v201_v18   ;;  %v200_v25 = vld [vmem:[%s482_s5] sm:$0x1]  ;;  %v209_v28 = vsub.s32 0, %v208_v27  ;;  %p358_p0 = scmp.ne.s32.totalorder %s296_s19, %s357_s4  ;;  %p362_p1 = scmp.lt.s32.totalorder %s296_s19, %s296_s19 }
   0xb   :  { %350 = vmatpush3.bf16.msra.mxu1 %v349_v12  ;;  %p363_p2 = scmp.lt.s32.totalorder %s361_s20, %s357_s4 }
   0xd   :  { %p364_p3 = por %p363_p2, %p362_p1 }
   0xf   :  { %p365_p4 = pnand %p364_p3, %p358_p0 }
  0x89   :  { %v205_v29 = vpop.permute.xlu0 %204 }
  0x8a   :  { %v210_v30 = vrot.slane %v205_v29, %v209_v28 }
  0xdc   :  { %v109_v14 = vpop.f32.mrb[0].mxu0 }
  0xdd   :  { %v110_v15 = vadd.f32 %v303_v13, %v109_v14  ;;  %v325_v16 = vpop.f32.mrb[1].mxu0 }
  0xdf   :  { %v113_v17 = vmax.f32 %v110_v15, 0.0 }
  0xe1   :  { %335 = vmatmul.mubr.msk.f32.vlgmr.msra.gmra.mrb[0].mxu1 %vm125_vm2, %v113_v17 }
 0x1b4   :  { %v195_v21 = vpop.f32.mrb[0].mxu1 }
 0x1b5   :  { %v196_v22 = vadd.f32 %v305_v20, %v195_v21  ;;  %v336_v23 = vpop.f32.mrb[1].mxu1 }
 0x1b7   :  { %v199_v24 = vmax.f32 %v196_v22, 0.0 }
 0x1b9   :  { %338 = vmatpush3.xpose.msk.msra.mxu0 %vm39_vm1, %v199_v24 }
 0x1bc   :  { %340 = vmatmul.mubr.msk.f32.vlgmr.msra.gmra.mrb[2].mxu0 %vm39_vm1, %v200_v25 }
 0x28f   :  { %v283_v31 = vpop.f32.mrb[2].mxu0 }
 0x290   :  { %v284_v32 = vadd.f32 %v283_v31, %v210_v30  ;;  %v341_v33 = vpop.f32.mrb[3].mxu0 }
 0x292   :  { %288 = vst.msk [vmem:[#allocation3] sm:$0x1] %vm287_vm3, %v284_v32 }
 0x293   :  { %368 = shalt.err (!%p365_p4)
}
 0x294   :  { %s369_s22 = scalar_lea.hbm %s484_s7, 16 }
 0x295   :  { %p370_p5 = scmp.ne.s32.totalorder %s484_s7, %s369_s22  ;;  %p373_p6 = scmp.lt.u32.totalorder %s369_s22, %s484_s7 }
 0x297   :  { %p375_p7 = pnand %p373_p6, %p370_p5 }
 0x299   :  { %378 = shalt.err (!%p375_p7)
}
 0x29a   :  { %298 = dma.vmem_to_hbm [thread:$0]  %s296_s19, 16, %s484_s7, [#allocation4]  }
 0x29b   :  { %379 = dma.done.wait [#allocation4], 16  }
 0x29c   :  { %380 = vsyncadd [#allocation4], 4294967280 }
 0x29d   :  { %302 = vsyncpa [#allocation4], 1 }

</bundles_post_ra>
